<compile_context>
chip_gen: v7x
topology: tpu7x:2x2x1
jax: 0.10.0
libtpu: 0.0.40
codegen_flags: <defaults>
</compile_context>

<pallas_src>
import math
import functools

import jax
import jax.numpy as jnp
from jax import lax
from jax.experimental import pallas as pl
from jax.experimental.pallas import tpu as pltpu


def _round_up(x, n):
    return ((x + n - 1) // n) * n


def _bf16_softmax_default():
    # bf16 EUP/VPU exists on v6e/v7x; keep the softmax numerator f32 on v5e & older.
    try:
        kind = jax.devices()[0].device_kind.lower()
    except Exception:
        return False
    return ("v6" in kind) or ("v7" in kind)


def _vmem_limit_bytes(S, F, Pp, Fp, att_itemsize):
    # Double-buffered blocks + rough in-flight temporaries, clamped v7x-safe.
    blocks = (2 * (2 * S * F * 2)                       # stacked [enc;dec] bf16
              + 2 * (F * Pp * 2 + Pp * 4 + Fp * F * 2 + F * 4)   # weights/biases
              + 2 * 2 * (S * S * att_itemsize)          # two att maps
              + 2 * (S * F * 4)                         # output block
              + S * F * 4)                              # acc scratch
    temps = 3 * (2 * S * Pp * 4) + 6 * (S * S * 4) + 2 * (S * Fp * 4)
    want = 2 * (blocks + temps) + (8 << 20)
    return int(min(max(want, 16 << 20), 56 << 20))


# ---------------------------------------------------------------------------
# Fused kernel: one (batch, head) step of bidirectional cross attention plus
# the per-head slice of the output projection accumulated into VMEM scratch.
# ---------------------------------------------------------------------------
def _bi_attn_head_kernel(x_ref, w_ref, b_ref, wo_ref, bo_ref,
                         att_e2d_ref, att_d2e_ref, out_ref, acc_ref,
                         *, seq, mp, bf16_exp):
    S, Mp = seq, mp
    h = pl.program_id(1)
    cdt = x_ref.dtype                         # bf16 compute dtype for the MXU

    @pl.when(h == 0)
    def _():
        acc_ref[...] = jnp.zeros_like(acc_ref)

    # Per-head fused Q/K/V projection of the stacked [enc; dec] rows.
    # Softmax scale 1/sqrt(M) is already folded into the wq/bq columns.
    proj = (jnp.dot(x_ref[0], w_ref[0], preferred_element_type=jnp.float32)
            + b_ref[0])                                      # (2S, Pp) f32

    # 128-lane-aligned column slices (padded with zeros at prep time); the
    # enc/dec row split is sublane-aligned in f32 (S multiple of 8).
    q_enc = proj[:S, :Mp].astype(cdt)
    q_dec = proj[S:, :Mp].astype(cdt)
    k_enc = proj[:S, Mp:2 * Mp].astype(cdt)
    k_dec = proj[S:, Mp:2 * Mp].astype(cdt)
    v_enc = proj[:S, 2 * Mp:].astype(cdt)
    v_dec = proj[S:, 2 * Mp:].astype(cdt)

    dn = (((1,), (1,)), ((), ()))             # contract last dims: Q @ K^T w/o .T
    s_e2d = lax.dot_general(q_enc, k_dec, dn, preferred_element_type=jnp.float32)
    s_d2e = lax.dot_general(q_dec, k_enc, dn, preferred_element_type=jnp.float32)

    def _softmax(s):
        m = jnp.max(s, axis=-1, keepdims=True)
        z = s - m
        e = jnp.exp(z.astype(jnp.bfloat16)) if bf16_exp else jnp.exp(z)
        r = jnp.sum(e.astype(jnp.float32), axis=-1, keepdims=True)
        return e * pl.reciprocal(r, approx=True)

    a_e2d = _softmax(s_e2d)
    a_d2e = _softmax(s_d2e)

    # bf16 attention-map writeback (half the HBM bytes / VMEM output blocks).
    att_e2d_ref[0, 0] = a_e2d.astype(att_e2d_ref.dtype)
    att_d2e_ref[0, 0] = a_d2e.astype(att_d2e_ref.dtype)

    ctx = (jnp.dot(a_e2d.astype(cdt), v_dec, preferred_element_type=jnp.float32)
           + jnp.dot(a_d2e.astype(cdt), v_enc, preferred_element_type=jnp.float32))

    # Per-head slice of the output projection, accumulated in f32 VMEM scratch.
    acc_ref[...] += jnp.dot(ctx.astype(cdt), wo_ref[0],
                            preferred_element_type=jnp.float32)

    @pl.when(h == pl.num_programs(1) - 1)
    def _():
        out_ref[0] = (acc_ref[...] + bo_ref[...]).astype(out_ref.dtype)


# ---------------------------------------------------------------------------
# One-time parameter fusion / padding / re-layout (hoisted out of the fwd path).
# ---------------------------------------------------------------------------
def prepare_fused_params(params, *, mem_dim, fea_dim, num_heads,
                         compute_dtype=jnp.bfloat16):
    M, F, H = mem_dim, fea_dim, num_heads
    Mp = _round_up(M, 128)                     # lane-aligned per-head Q/K width
    Fp = _round_up(F, 128)                     # lane-aligned per-head V width
    Pp = 2 * Mp + Fp
    scale = 1.0 / math.sqrt(M)                 # folded into wq / bq (free at load)

    wq = jnp.transpose(params["wq"].reshape(F, H, M), (1, 0, 2)) * scale
    wk = jnp.transpose(params["wk"].reshape(F, H, M), (1, 0, 2))
    wv = jnp.transpose(params["wv"].reshape(F, H, F), (1, 0, 2))
    bq = params["bq"].reshape(H, M) * scale
    bk = params["bk"].reshape(H, M)
    bv = params["bv"].reshape(H, F)

    w_heads = jnp.zeros((H, F, Pp), jnp.float32)
    w_heads = w_heads.at[:, :, :M].set(wq)
    w_heads = w_heads.at[:, :, Mp:Mp + M].set(wk)
    w_heads = w_heads.at[:, :, 2 * Mp:2 * Mp + F].set(wv)

    b_heads = jnp.zeros((H, 1, Pp), jnp.float32)
    b_heads = b_heads.at[:, 0, :M].set(bq)
    b_heads = b_heads.at[:, 0, Mp:Mp + M].set(bk)
    b_heads = b_heads.at[:, 0, 2 * Mp:2 * Mp + F].set(bv)

    wo_heads = jnp.zeros((H, Fp, F), jnp.float32)
    wo_heads = wo_heads.at[:, :F, :].set(params["wo"].reshape(H, F, F))

    return {
        "w_heads": w_heads.astype(compute_dtype),    # (H, F, Pp)
        "b_heads": b_heads,                          # (H, 1, Pp) f32
        "wo_heads": wo_heads.astype(compute_dtype),  # (H, Fp, F)
        "bo": params["bo"].reshape(1, F).astype(jnp.float32),
        "dims": (M, F, H, Mp, Fp, Pp),
    }


# ---------------------------------------------------------------------------
# Attention unit wrapper (encoder/decoder as (B, S, F) token sequences).
# ---------------------------------------------------------------------------
def bidirectional_interactive_attention(encoder_output, decoder_output, fused,
                                        *, att_dtype=jnp.bfloat16,
                                        bf16_softmax=None):
    B, S, F = encoder_output.shape
    M, F_, H, Mp, Fp, Pp = fused["dims"]
    assert F_ == F
    if bf16_softmax is None:
        bf16_softmax = _bf16_softmax_default()
    cdt = fused["w_heads"].dtype

    # Stack [enc; dec] along the sequence axis once, already in compute dtype.
    x = jnp.concatenate([encoder_output, decoder_output], axis=1).astype(cdt)

    att_shape = jax.ShapeDtypeStruct((B, H, S, S), att_dtype)
    out_shape = jax.ShapeDtypeStruct((B, S, F), jnp.float32)

    kernel = functools.partial(_bi_attn_head_kernel,
                               seq=S, mp=Mp, bf16_exp=bool(bf16_softmax))

    # TODO(synk): for very long S add a flash-style query/key-tiled variant (it
    # would also give v7x a parallel query-tile axis when B == 1); at small S
    # the (S,S)/(S,F) stores are masked (sub-128 lanes) — a lane-dense flatten
    # of those outputs is a further win not applied here.
    att_e2d, att_d2e, y = pl.pallas_call(
        kernel,
        out_shape=(att_shape, att_shape, out_shape),
        grid_spec=pltpu.PrefetchScalarGridSpec(
            num_scalar_prefetch=0,
            grid=(B, H),
            in_specs=[
                pl.BlockSpec((1, 2 * S, F), lambda b, h: (b, 0, 0)),  # [enc;dec]
                pl.BlockSpec((1, F, Pp), lambda b, h: (h, 0, 0)),     # per-head W
                pl.BlockSpec((1, 1, Pp), lambda b, h: (h, 0, 0)),     # per-head bias
                pl.BlockSpec((1, Fp, F), lambda b, h: (h, 0, 0)),     # per-head Wo
                pl.BlockSpec((1, F), lambda b, h: (0, 0)),            # bo (const)
            ],
            out_specs=[
                pl.BlockSpec((1, 1, S, S), lambda b, h: (b, h, 0, 0)),
                pl.BlockSpec((1, 1, S, S), lambda b, h: (b, h, 0, 0)),
                pl.BlockSpec((1, S, F), lambda b, h: (b, 0, 0)),      # accumulator
            ],
            scratch_shapes=[pltpu.VMEM((S, F), jnp.float32)],
        ),
        compiler_params=pltpu.CompilerParams(
            dimension_semantics=("parallel", "arbitrary"),
            vmem_limit_bytes=_vmem_limit_bytes(
                S, F, Pp, Fp, jnp.dtype(att_dtype).itemsize),
        ),
    )(x, fused["w_heads"], fused["b_heads"], fused["wo_heads"], fused["bo"])

    return {"output": y, "att_enc2dec": att_e2d, "att_dec2enc": att_d2e}


# ---------------------------------------------------------------------------
# Mem-module wrapper: channels-first (B, C, spatial...) -> channels-last tokens.
# ---------------------------------------------------------------------------
def bidirectional_interactive_mem_module(encoder_input, decoder_input, fused):
    # TODO(synk): the original PyTorch MemModule flattens the channels-last map
    # to 2D before the attention unit (degenerate seq-len-1 attention) and
    # reshapes attention maps with a hard-coded `8`; here the spatial positions
    # are kept as the sequence axis (the non-degenerate reading of the math).
    s_enc = encoder_input.shape
    B, C = s_enc[0], s_enc[1]
    spatial = s_enc[2:]
    perm = (0,) + tuple(range(2, len(s_enc))) + (1,)
    enc = jnp.transpose(encoder_input, perm).reshape(B, -1, C)
    dec = jnp.transpose(decoder_input, perm).reshape(B, -1, C)

    res = bidirectional_interactive_attention(enc, dec, fused)

    y = res["output"].reshape((B,) + spatial + (C,))
    inv = (0, len(s_enc) - 1) + tuple(range(1, len(s_enc) - 1))
    y = jnp.transpose(y, inv)
    return {"output": y,
            "att_enc2dec": res["att_enc2dec"],
            "att_dec2enc": res["att_dec2enc"]}


# ---------------------------------------------------------------------------
# Pure-JAX f32 reference (mirrors the PyTorch attention-unit forward).
# ---------------------------------------------------------------------------
def _reference(enc, dec, params, *, mem_dim, fea_dim, num_heads):
    B, S, F = enc.shape
    H, M = num_heads, mem_dim

    def lin(x, w, b):
        return x @ w + b

    def split_heads(y, d):
        return y.reshape(B, S, H, d).transpose(0, 2, 1, 3)

    q_enc = split_heads(lin(enc, params["wq"], params["bq"]), M)
    k_dec = split_heads(lin(dec, params["wk"], params["bk"]), M)
    v_dec = split_heads(lin(dec, params["wv"], params["bv"]), F)
    q_dec = split_heads(lin(dec, params["wq"], params["bq"]), M)
    k_enc = split_heads(lin(enc, params["wk"], params["bk"]), M)
    v_enc = split_heads(lin(enc, params["wv"], params["bv"]), F)

    a_e2d = jax.nn.softmax(
        jnp.einsum("bhqm,bhkm->bhqk", q_enc, k_dec) / math.sqrt(M), axis=-1)
    a_d2e = jax.nn.softmax(
        jnp.einsum("bhqm,bhkm->bhqk", q_dec, k_enc) / math.sqrt(M), axis=-1)

    out = (jnp.einsum("bhqk,bhkf->bhqf", a_e2d, v_dec)
           + jnp.einsum("bhqk,bhkf->bhqf", a_d2e, v_enc))
    out = out.transpose(0, 2, 1, 3).reshape(B, S, H * F)
    out = out @ params["wo"] + params["bo"]
    return {"output": out, "att_enc2dec": a_e2d, "att_dec2enc": a_d2e}


if __name__ == "__main__":
    B, S = 2, 8
    fea_dim, mem_dim, num_heads = 32, 16, 4
    H, M, F = num_heads, mem_dim, fea_dim

    key = jax.random.PRNGKey(0)
    ks = jax.random.split(key, 10)

    def uinit(k, shape, fan_in):
        s = 1.0 / math.sqrt(fan_in)
        return jax.random.uniform(k, shape, minval=-s, maxval=s, dtype=jnp.float32)

    # nn.Linear weights stored as (in, out) for y = x @ W + b.
    params = {
        "wq": uinit(ks[0], (F, H * M), F), "bq": uinit(ks[1], (H * M,), F),
        "wk": uinit(ks[2], (F, H * M), F), "bk": uinit(ks[3], (H * M,), F),
        "wv": uinit(ks[4], (F, H * F), F), "bv": uinit(ks[5], (H * F,), F),
        "wo": uinit(ks[6], (H * F, F), H * F), "bo": uinit(ks[7], (F,), H * F),
    }
    # One-time weight fusion: scale folding, 128-lane padding, bf16 cast.
    fused = prepare_fused_params(params, mem_dim=M, fea_dim=F, num_heads=H)

    encoder_output = jax.random.normal(ks[8], (B, S, F), dtype=jnp.float32)
    decoder_output = jax.random.normal(ks[9], (B, S, F), dtype=jnp.float32)

    # --- attention unit on (B, S, F) tokens --------------------------------
    result = bidirectional_interactive_attention(encoder_output, decoder_output,
                                                 fused)
    jax.block_until_ready(result)

    ref = _reference(encoder_output, decoder_output, params,
                     mem_dim=M, fea_dim=F, num_heads=H)

    # bf16 MXU operands / bf16 attention maps with f32 accumulation.
    for name in ("output", "att_enc2dec", "att_dec2enc"):
        if not jnp.allclose(result[name].astype(jnp.float32), ref[name],
                            atol=2e-2, rtol=2e-2):
            raise AssertionError(f"mismatch in {name}")

    # --- mem-module wrapper on channels-first (B, C, L) input --------------
    enc_cf = jnp.transpose(encoder_output, (0, 2, 1))   # (B, C=F, L=S)
    dec_cf = jnp.transpose(decoder_output, (0, 2, 1))
    mem_res = bidirectional_interactive_mem_module(enc_cf, dec_cf, fused)
    jax.block_until_ready(mem_res)
    if not jnp.allclose(mem_res["output"],
                        jnp.transpose(ref["output"], (0, 2, 1)),
                        atol=2e-2, rtol=2e-2):
        raise AssertionError("mismatch in mem-module output")

    print("KERNEL_OK")
</pallas_src>

<mosaic_0001>
module attributes {stable_mosaic.version = 11 : i64} {
  func.func @_bi_attn_head_kernel(%arg0: i32, %arg1: i32, %arg2: memref<1x16x32xbf16, #tpu.memory_space<vmem>>, %arg3: memref<1x32x384xbf16, #tpu.memory_space<vmem>>, %arg4: memref<1x1x384xf32, #tpu.memory_space<vmem>>, %arg5: memref<1x128x32xbf16, #tpu.memory_space<vmem>>, %arg6: memref<1x32xf32, #tpu.memory_space<vmem>>, %arg7: memref<1x1x8x8xbf16, #tpu.memory_space<vmem>>, %arg8: memref<1x1x8x8xbf16, #tpu.memory_space<vmem>>, %arg9: memref<1x8x32xf32, #tpu.memory_space<vmem>>, %arg10: memref<8x32xf32, #tpu.memory_space<vmem>>) attributes {dimension_semantics = [#tpu.dimension_semantics<parallel>, #tpu.dimension_semantics<arbitrary>], iteration_bounds = array<i64: 2, 4>, scalar_prefetch = 0 : i64, scratch_operands = 1 : i64, tpu.core_type = #tpu.core_type<tc>, window_params = [{transform_indices = @transform_0, window_bounds = array<i64: 1, 16, 32>}, {transform_indices = @transform_1, window_bounds = array<i64: 1, 32, 384>}, {transform_indices = @transform_2, window_bounds = array<i64: 1, 1, 384>}, {transform_indices = @transform_3, window_bounds = array<i64: 1, 128, 32>}, {pipeline_mode = #tpu.pipeline_mode<synchronous>, transform_indices = @transform_4, window_bounds = array<i64: 1, 32>}, {transform_indices = @transform_5, window_bounds = array<i64: 1, 1, 8, 8>}, {transform_indices = @transform_6, window_bounds = array<i64: 1, 1, 8, 8>}, {transform_indices = @transform_7, window_bounds = array<i64: 1, 8, 32>}]} {
    %c0_i32 = arith.constant 0 : i32
    %0 = arith.cmpi eq, %arg1, %c0_i32 : i32
    %1 = arith.extui %0 : i1 to i32
    %c0_i32_0 = arith.constant 0 : i32
    %2 = arith.cmpi ne, %1, %c0_i32_0 : i32
    scf.if %2 {
      %cst_34 = arith.constant 0.000000e+00 : f32
      %69 = vector.broadcast %cst_34 : f32 to vector<8x32xf32>
      %c0_35 = arith.constant 0 : index
      %c0_36 = arith.constant 0 : index
      %70 = vector.load %arg10[%c0_35, %c0_36] : memref<8x32xf32, #tpu.memory_space<vmem>>, vector<8x32xf32>
      tpu.vector_store %arg10[%c0_35, %c0_36], %69 {strides = array<i32>} : memref<8x32xf32, #tpu.memory_space<vmem>>, vector<8x32xf32>,
    } else {
    }
    %c0 = arith.constant 0 : index
    %c0_1 = arith.constant 0 : index
    %c0_2 = arith.constant 0 : index
    %3 = vector.load %arg2[%c0, %c0_1, %c0_2] : memref<1x16x32xbf16, #tpu.memory_space<vmem>>, vector<1x16x32xbf16>
    %4 = vector.shape_cast %3 : vector<1x16x32xbf16> to vector<16x32xbf16>
    %c0_3 = arith.constant 0 : index
    %c0_4 = arith.constant 0 : index
    %c0_5 = arith.constant 0 : index
    %5 = vector.load %arg3[%c0_3, %c0_4, %c0_5] : memref<1x32x384xbf16, #tpu.memory_space<vmem>>, vector<1x32x384xbf16>
    %6 = vector.shape_cast %5 : vector<1x32x384xbf16> to vector<32x384xbf16>
    %cst = arith.constant dense<0.000000e+00> : vector<16x384xf32>
    %7 = tpu.matmul %4, %6, %cst {dimension_numbers = #tpu.dot_dimension_numbers<[1], [0], [0], [1], [0, 0, 1, 1], [], []>} : vector<16x32xbf16>, vector<32x384xbf16>, vector<16x384xf32> -> vector<16x384xf32>
    %c0_6 = arith.constant 0 : index
    %c0_7 = arith.constant 0 : index
    %c0_8 = arith.constant 0 : index
    %8 = vector.load %arg4[%c0_6, %c0_7, %c0_8] : memref<1x1x384xf32, #tpu.memory_space<vmem>>, vector<1x1x384xf32>
    %9 = vector.shape_cast %8 : vector<1x1x384xf32> to vector<1x384xf32>
    %10 = vector.broadcast %9 : vector<1x384xf32> to vector<16x384xf32>
    %11 = arith.addf %7, %10 : vector<16x384xf32>
    %12 = vector.extract_strided_slice %11 {offsets = [0, 0], sizes = [8, 128], strides = [1, 1]} : vector<16x384xf32> to vector<8x128xf32>
    %13 = arith.truncf %12 : vector<8x128xf32> to vector<8x128xbf16>
    %14 = vector.extract_strided_slice %11 {offsets = [8, 0], sizes = [8, 128], strides = [1, 1]} : vector<16x384xf32> to vector<8x128xf32>
    %15 = arith.truncf %14 : vector<8x128xf32> to vector<8x128xbf16>
    %16 = vector.extract_strided_slice %11 {offsets = [0, 128], sizes = [8, 128], strides = [1, 1]} : vector<16x384xf32> to vector<8x128xf32>
    %17 = arith.truncf %16 : vector<8x128xf32> to vector<8x128xbf16>
    %18 = vector.extract_strided_slice %11 {offsets = [8, 128], sizes = [8, 128], strides = [1, 1]} : vector<16x384xf32> to vector<8x128xf32>
    %19 = arith.truncf %18 : vector<8x128xf32> to vector<8x128xbf16>
    %20 = vector.extract_strided_slice %11 {offsets = [0, 256], sizes = [8, 128], strides = [1, 1]} : vector<16x384xf32> to vector<8x128xf32>
    %21 = arith.truncf %20 : vector<8x128xf32> to vector<8x128xbf16>
    %22 = vector.extract_strided_slice %11 {offsets = [8, 256], sizes = [8, 128], strides = [1, 1]} : vector<16x384xf32> to vector<8x128xf32>
    %23 = arith.truncf %22 : vector<8x128xf32> to vector<8x128xbf16>
    %cst_9 = arith.constant dense<0.000000e+00> : vector<8x8xf32>
    %24 = tpu.matmul %13, %19, %cst_9 {dimension_numbers = #tpu.dot_dimension_numbers<[1], [1], [0], [0], [0, 0, 1, 0], [], []>} : vector<8x128xbf16>, vector<8x128xbf16>, vector<8x8xf32> -> vector<8x8xf32>
    %cst_10 = arith.constant dense<0.000000e+00> : vector<8x8xf32>
    %25 = tpu.matmul %15, %17, %cst_10 {dimension_numbers = #tpu.dot_dimension_numbers<[1], [1], [0], [0], [0, 0, 1, 0], [], []>} : vector<8x128xbf16>, vector<8x128xbf16>, vector<8x8xf32> -> vector<8x8xf32>
    %cst_11 = arith.constant dense<0xFF800000> : vector<8xf32>
    %26 = vector.multi_reduction <maximumf>, %24, %cst_11 [1] : vector<8x8xf32> to vector<8xf32>
    %27 = vector.shape_cast %26 : vector<8xf32> to vector<8x1xf32>
    %28 = vector.broadcast %27 : vector<8x1xf32> to vector<8x8xf32>
    %29 = arith.subf %24, %28 : vector<8x8xf32>
    %30 = math.exp %29 : vector<8x8xf32>
    %cst_12 = arith.constant dense<0.000000e+00> : vector<8xf32>
    %31 = vector.multi_reduction <add>, %30, %cst_12 [1] : vector<8x8xf32> to vector<8xf32>
    %32 = vector.shape_cast %31 : vector<8xf32> to vector<8x1xf32>
    %33 = tpu.reciprocal %32 {approx = true} : vector<8x1xf32> -> vector<8x1xf32>
    %34 = vector.broadcast %33 : vector<8x1xf32> to vector<8x8xf32>
    %35 = arith.mulf %30, %34 : vector<8x8xf32>
    %cst_13 = arith.constant dense<0xFF800000> : vector<8xf32>
    %36 = vector.multi_reduction <maximumf>, %25, %cst_13 [1] : vector<8x8xf32> to vector<8xf32>
    %37 = vector.shape_cast %36 : vector<8xf32> to vector<8x1xf32>
    %38 = vector.broadcast %37 : vector<8x1xf32> to vector<8x8xf32>
    %39 = arith.subf %25, %38 : vector<8x8xf32>
    %40 = math.exp %39 : vector<8x8xf32>
    %cst_14 = arith.constant dense<0.000000e+00> : vector<8xf32>
    %41 = vector.multi_reduction <add>, %40, %cst_14 [1] : vector<8x8xf32> to vector<8xf32>
    %42 = vector.shape_cast %41 : vector<8xf32> to vector<8x1xf32>
    %43 = tpu.reciprocal %42 {approx = true} : vector<8x1xf32> -> vector<8x1xf32>
    %44 = vector.broadcast %43 : vector<8x1xf32> to vector<8x8xf32>
    %45 = arith.mulf %40, %44 : vector<8x8xf32>
    %46 = arith.truncf %35 : vector<8x8xf32> to vector<8x8xbf16>
    %c0_15 = arith.constant 0 : index
    %c0_16 = arith.constant 0 : index
    %c0_17 = arith.constant 0 : index
    %c0_18 = arith.constant 0 : index
    %47 = vector.load %arg7[%c0_15, %c0_16, %c0_17, %c0_18] : memref<1x1x8x8xbf16, #tpu.memory_space<vmem>>, vector<1x1x8x8xbf16>
    %48 = vector.shape_cast %47 : vector<1x1x8x8xbf16> to vector<8x8xbf16>
    %49 = vector.shape_cast %46 : vector<8x8xbf16> to vector<1x1x8x8xbf16>
    tpu.vector_store %arg7[%c0_15, %c0_16, %c0_17, %c0_18], %49 {strides = array<i32>} : memref<1x1x8x8xbf16, #tpu.memory_space<vmem>>, vector<1x1x8x8xbf16>,
    %50 = arith.truncf %45 : vector<8x8xf32> to vector<8x8xbf16>
    %c0_19 = arith.constant 0 : index
    %c0_20 = arith.constant 0 : index
    %c0_21 = arith.constant 0 : index
    %c0_22 = arith.constant 0 : index
    %51 = vector.load %arg8[%c0_19, %c0_20, %c0_21, %c0_22] : memref<1x1x8x8xbf16, #tpu.memory_space<vmem>>, vector<1x1x8x8xbf16>
    %52 = vector.shape_cast %51 : vector<1x1x8x8xbf16> to vector<8x8xbf16>
    %53 = vector.shape_cast %50 : vector<8x8xbf16> to vector<1x1x8x8xbf16>
    tpu.vector_store %arg8[%c0_19, %c0_20, %c0_21, %c0_22], %53 {strides = array<i32>} : memref<1x1x8x8xbf16, #tpu.memory_space<vmem>>, vector<1x1x8x8xbf16>,
    %54 = arith.truncf %35 : vector<8x8xf32> to vector<8x8xbf16>
    %cst_23 = arith.constant dense<0.000000e+00> : vector<8x128xf32>
    %55 = tpu.matmul %54, %23, %cst_23 {dimension_numbers = #tpu.dot_dimension_numbers<[1], [0], [0], [1], [0, 0, 1, 1], [], []>} : vector<8x8xbf16>, vector<8x128xbf16>, vector<8x128xf32> -> vector<8x128xf32>
    %56 = arith.truncf %45 : vector<8x8xf32> to vector<8x8xbf16>
    %cst_24 = arith.constant dense<0.000000e+00> : vector<8x128xf32>
    %57 = tpu.matmul %56, %21, %cst_24 {dimension_numbers = #tpu.dot_dimension_numbers<[1], [0], [0], [1], [0, 0, 1, 1], [], []>} : vector<8x8xbf16>, vector<8x128xbf16>, vector<8x128xf32> -> vector<8x128xf32>
    %58 = arith.addf %55, %57 : vector<8x128xf32>
    %c0_25 = arith.constant 0 : index
    %c0_26 = arith.constant 0 : index
    %59 = vector.load %arg10[%c0_25, %c0_26] : memref<8x32xf32, #tpu.memory_space<vmem>>, vector<8x32xf32>
    %60 = arith.truncf %58 : vector<8x128xf32> to vector<8x128xbf16>
    %c0_27 = arith.constant 0 : index
    %c0_28 = arith.constant 0 : index
    %c0_29 = arith.constant 0 : index
    %61 = vector.load %arg5[%c0_27, %c0_28, %c0_29] : memref<1x128x32xbf16, #tpu.memory_space<vmem>>, vector<1x128x32xbf16>
    %62 = vector.shape_cast %61 : vector<1x128x32xbf16> to vector<128x32xbf16>
    %cst_30 = arith.constant dense<0.000000e+00> : vector<8x32xf32>
    %63 = tpu.matmul %60, %62, %cst_30 {dimension_numbers = #tpu.dot_dimension_numbers<[1], [0], [0], [1], [0, 0, 1, 1], [], []>} : vector<8x128xbf16>, vector<128x32xbf16>, vector<8x32xf32> -> vector<8x32xf32>
    %64 = arith.addf %59, %63 : vector<8x32xf32>
    %c0_31 = arith.constant 0 : index
    %c0_32 = arith.constant 0 : index
    %65 = vector.load %arg10[%c0_31, %c0_32] : memref<8x32xf32, #tpu.memory_space<vmem>>, vector<8x32xf32>
    tpu.vector_store %arg10[%c0_31, %c0_32], %64 {strides = array<i32>} : memref<8x32xf32, #tpu.memory_space<vmem>>, vector<8x32xf32>,
    %c3_i32 = arith.constant 3 : i32
    %66 = arith.cmpi eq, %arg1, %c3_i32 : i32
    %67 = arith.extui %66 : i1 to i32
    %c0_i32_33 = arith.constant 0 : i32
    %68 = arith.cmpi ne, %67, %c0_i32_33 : i32
    scf.if %68 {
      %c0_34 = arith.constant 0 : index
      %c0_35 = arith.constant 0 : index
      %69 = vector.load %arg10[%c0_34, %c0_35] : memref<8x32xf32, #tpu.memory_space<vmem>>, vector<8x32xf32>
      %c0_36 = arith.constant 0 : index
      %c0_37 = arith.constant 0 : index
      %70 = vector.load %arg6[%c0_36, %c0_37] : memref<1x32xf32, #tpu.memory_space<vmem>>, vector<1x32xf32>
      %71 = vector.broadcast %70 : vector<1x32xf32> to vector<8x32xf32>
      %72 = arith.addf %69, %71 : vector<8x32xf32>
      %c0_38 = arith.constant 0 : index
      %c0_39 = arith.constant 0 : index
      %c0_40 = arith.constant 0 : index
      %73 = vector.load %arg9[%c0_38, %c0_39, %c0_40] : memref<1x8x32xf32, #tpu.memory_space<vmem>>, vector<1x8x32xf32>
      %74 = vector.shape_cast %73 : vector<1x8x32xf32> to vector<8x32xf32>
      %75 = vector.shape_cast %72 : vector<8x32xf32> to vector<1x8x32xf32>
      tpu.vector_store %arg9[%c0_38, %c0_39, %c0_40], %75 {strides = array<i32>} : memref<1x8x32xf32, #tpu.memory_space<vmem>>, vector<1x8x32xf32>,
    } else {
    }
    return
  }
  func.func @transform_0(%arg0: i32, %arg1: i32) -> (i32, i32, i32) {
    %c0_i32 = arith.constant 0 : i32
    %c0_i32_0 = arith.constant 0 : i32
    %c0_i32_1 = arith.constant 0 : i32
    return %arg0, %c0_i32, %c0_i32_0 : i32, i32, i32
  }
  func.func @transform_1(%arg0: i32, %arg1: i32) -> (i32, i32, i32) {
    %c0_i32 = arith.constant 0 : i32
    %c0_i32_0 = arith.constant 0 : i32
    %c0_i32_1 = arith.constant 0 : i32
    return %arg1, %c0_i32, %c0_i32_0 : i32, i32, i32
  }
  func.func @transform_2(%arg0: i32, %arg1: i32) -> (i32, i32, i32) {
    %c0_i32 = arith.constant 0 : i32
    %c0_i32_0 = arith.constant 0 : i32
    %c0_i32_1 = arith.constant 0 : i32
    return %arg1, %c0_i32, %c0_i32_0 : i32, i32, i32
  }
  func.func @transform_3(%arg0: i32, %arg1: i32) -> (i32, i32, i32) {
    %c0_i32 = arith.constant 0 : i32
    %c0_i32_0 = arith.constant 0 : i32
    %c0_i32_1 = arith.constant 0 : i32
    return %arg1, %c0_i32, %c0_i32_0 : i32, i32, i32
  }
  func.func @transform_4(%arg0: i32, %arg1: i32) -> (i32, i32) {
    %c0_i32 = arith.constant 0 : i32
    %c0_i32_0 = arith.constant 0 : i32
    %c0_i32_1 = arith.constant 0 : i32
    return %c0_i32, %c0_i32_0 : i32, i32
  }
  func.func @transform_5(%arg0: i32, %arg1: i32) -> (i32, i32, i32, i32) {
    %c0_i32 = arith.constant 0 : i32
    %c0_i32_0 = arith.constant 0 : i32
    %c0_i32_1 = arith.constant 0 : i32
    return %arg0, %arg1, %c0_i32, %c0_i32_0 : i32, i32, i32, i32
  }
  func.func @transform_6(%arg0: i32, %arg1: i32) -> (i32, i32, i32, i32) {
    %c0_i32 = arith.constant 0 : i32
    %c0_i32_0 = arith.constant 0 : i32
    %c0_i32_1 = arith.constant 0 : i32
    return %arg0, %arg1, %c0_i32, %c0_i32_0 : i32, i32, i32, i32
  }
  func.func @transform_7(%arg0: i32, %arg1: i32) -> (i32, i32, i32) {
    %c0_i32 = arith.constant 0 : i32
    %c0_i32_0 = arith.constant 0 : i32
    %c0_i32_1 = arith.constant 0 : i32
    return %arg0, %c0_i32, %c0_i32_0 : i32, i32, i32
  }
}

</mosaic_0001>

<bundles_post_ra>
// kernel: tpu_custom_call.1
= control target key start
LH: loop header
LB: loop body
LE: loop exit
PB: predicated region body
PF: predicated region fallthrough
CT: control target
= control target key end

     0   :  { %s1920_s0 = inlined_call_operand.vmem [shape: bf16[2,16,32], index: 0, kind: input, shape index: {}]   ;;  %s1921_s1 = inlined_call_operand.vmem [shape: bf16[4,32,384], index: 1, kind: input, shape index: {}]   ;;  %s1922_s2 = inlined_call_operand.vmem [shape: f32[4,1,384], index: 2, kind: input, shape index: {}]   ;;  %s1923_s3 = inlined_call_operand.vmem [shape: bf16[4,128,32], index: 3, kind: input, shape index: {}]   ;;  %s1924_s4 = inlined_call_operand.vmem [shape: f32[1,32], index: 4, kind: input, shape index: {}]   ;;  %s1925_s5 = inlined_call_operand.hbm [shape: bf16[2,4,8,8], index: 5, kind: output, shape index: {0}]   ;;  %s1926_s6 = inlined_call_operand.hbm [shape: bf16[2,4,8,8], index: 6, kind: output, shape index: {1}]   ;;  %s1927_s7 = inlined_call_operand.hbm [shape: f32[2,8,32], index: 7, kind: output, shape index: {2}]  }
   0x1   :  { %1946 = sst [smem:[#allocation24_spill]] %s1925_s5 }
   0x2   :  { %1947 = sst [smem:[#allocation25_spill]] %s1927_s7 }
   0x3   :  { %13 = vsyncpa [#allocation4], 0 }
   0x4   :  { %15 = vsyncpa [#allocation4 + $0x1], 0 }
   0x5   :  { %16 = vsyncpa [#allocation6], 0 }
   0x6   :  { %18 = vsyncpa [#allocation6 + $0x1], 0  ;;  %s1571_s24 = smov 0   ;;  %s1573_s25 = smov 0  }
   0x7   :  { %s1575_s26 = smov 0   ;;  %s1577_s27 = smov 0  }
   0x8   :  { %s1579_s28 = smov 0   ;;  %s1581_s29 = smov 0  }
   0x9   :  { %s1583_s30 = smov 0   ;;  %s1585_s8 = smov 0  }
   0xa   :  { %s1587_s9 = smov 0   ;;  %s1589_s10 = smov 0  }
   0xb   :  { %s1591_s11 = smov 0  }
   0xc LB: > { %1948 = sst [smem:[#allocation11_spill]] %s1486_s25  ;;  %s1928_s12 = sadd.s32 4294967295, %s1522_s11   ;;  %s1522_s11 = sphi %s1591_s11, %s24_s11   ;;  %s1518_s10 = sphi %s1589_s10, %s1987_s10   ;;  %s1514_s9 = sphi %s1587_s9, %s1986_s9   ;;  %s1510_s8 = sphi %s1585_s8, %s1985_s8   ;;  %s1506_s30 = sphi %s1583_s30, %s1984_s30   ;;  %s1502_s29 = sphi %s1581_s29, %s1983_s29   ;;  %s1498_s28 = sphi %s1579_s28, %s1989_s28   ;;  %s1494_s27 = sphi %s1577_s27, %s1988_s27   ;;  %s1490_s26 = sphi %s1575_s26, %s1981_s26   ;;  %s1486_s25 = sphi %s1573_s25, %s1980_s25   ;;  %s1482_s24 = sphi %s1571_s24, %s1979_s24  }
   0xd   : > { %1949 = sst [smem:[#allocation12_spill]] %s1490_s26  ;;  %s1929_s13 = sadd.s32 4294967294, %s1522_s11  }
   0xe   : > { %1950 = sst [smem:[#allocation13_spill]] %s1494_s27  ;;  %s33_s14 = sadd.s32 1, %s1514_s9 }
   0xf   : > { %1951 = sst [smem:[#allocation14_spill]] %s1502_s29  ;;  %s36_s15 = sadd.s32 1, %s1518_s10 }
  0x10   : > { %1952 = sst [smem:[#allocation15_spill]] %s1514_s9  ;;  %p34_p0 = scmp.ge.s32.totalorder %s33_s14, 4 }
  0x11   : > { %1953 = sst [smem:[#allocation16_spill]] %s1518_s10  ;;  %s170_s16 = sadd.s32 1, %s1502_s29 }
  0x12   : > { %p180_p1 = scmp.ne.s32.totalorder %s1502_s29, %s1498_s28  ;;  %p1635_p2 = scmp.eq.s32.totalorder %s1928_s12, 7 }
  0x13   : > { %s1991_s14 = smov (%p34_p0, %s33_s14), 0  ;;  %s1993_s15 = smov (!%p34_p0, %s36_s15), %s1518_s10 }
  0x14   : > { %1955 = sst [smem:[#allocation17_spill]] %s1991_s14  ;;  %s166_s18 = ssub.s32 %s1514_s9, %s1991_s14 }
  0x15   : > { %p1646_p3 = por %p1635_p2, %p180_p1  ;;  %p38_p4 = scmp.ge.s32.totalorder %s1993_s15, 2 }
  0x16   : > { %p186_p5 = scmp.ne.s32.totalorder %s1498_s28, %s1494_s27  ;;  %p1654_p6 = scmp.eq.s32.totalorder %s1929_s13, 7 }
  0x17   : > { %s224_s21 = sadd.s32 1, %s1490_s26  ;;  %s1995_s15 = smov (%p38_p4, %s1993_s15), 0 }
  0x18   : > { %1958 = sst [smem:[#allocation18_spill]] %s1995_s15  ;;  %p1663_p7 = por %p1654_p6, %p186_p5 }
  0x19   : > { %p234_p8 = scmp.ne.s32.totalorder %s1490_s26, %s1486_s25  ;;  %s165_s23 = ssub.s32 %s1518_s10, %s1995_s15 }
  0x1a   : > { %s1959_s22 = scalar_select %p1663_p7, 1, 0 }
  0x1b   : > { %p240_p9 = scmp.ne.s32.totalorder %s1486_s25, %s1482_s24  ;;  %s167_s12 = sor.u32 %s166_s18, %s165_s23 }
  0x1c   : > { %1960 = sst [smem:[#allocation19_spill]] %s1959_s22  ;;  %p222_p10 = scmp.eq.s32.totalorder %s165_s23, 0 }
  0x1d   : > { %p168_p11 = scmp.eq.s32.totalorder %s167_s12, 0  ;;  %p1675_p12 = por %p234_p8, %p1635_p2 }
  0x1e   : > { %s1680_s14 = scalar_select %p222_p10, %s1490_s26, %s224_s21  }
  0x1f   : > { %s1961_s13 = scalar_select %p1675_p12, 1, 0 }
  0x20   : > { %1963 = sst [smem:[#allocation21_spill]] %s1680_s14  ;;  %p1687_p13 = por %p240_p9, %p1654_p6 }
  0x21   : > { %1962 = sst [smem:[#allocation20_spill]] %s1961_s13  ;;  %p1085_p0 = scmp.ge.s32.totalorder %s1522_s11, 1 }
  0x22   : > { %s1683_s9 = scalar_select %p168_p11, %s1502_s29, %s170_s16  }
  0x23   : > { %s1965_s27 = scalar_select %p1687_p13, 1, 0 }
  0x24   : > { %1964 = sst [smem:[#allocation22_spill]] %s1683_s9  ;;  %p293_p1 = scmp.lt.s32.totalorder %s1522_s11, 9 }
  0x25   : > { %1966 = sst [smem:[#allocation23_spill]] %s1965_s27 }
  0x26   : > { %p294_p4 = pnand %p1085_p0, %p293_p1 }
  0x27   : > { %s1937_s24 = sand.u32 (!%p294_p4), 1, %s1498_s28   ;;  %s346_s12 = sand.u32 (!%p294_p4), 1, %s1486_s25  }
  0x28   : > { %297 = sbr.rel (%p294_p4) target bundleno = 1346 (0x542), region = 40  ;;  %s1697_s16 = sshll.u32 (!%p294_p4), %s1937_s24, 2 }
  0x29   : > { %s1699_s17 = sshll.u32 (!%p294_p4), %s346_s12, 3  ;;  %p349_p2 = scmp.lt.s32.totalorder (!%p294_p4), %s1510_s8, 1 }
  0x2a   : > { %p354_p5 = scmp.lt.s32.totalorder (!%p294_p4), %s1506_s30, 3  ;;  %s334_s5 = scalar_lea.vmem (!%p294_p4), [#allocation3], %s1697_s16 }
  0x2b   : > { %s341_s15 = scalar_lea.vmem (!%p294_p4), [#allocation5], %s1697_s16  ;;  %p1094_p6 = scmp.ne.s32.totalorder (!%p294_p4), %s1506_s30, 0 }
  0x2f   : > { %s350_s18 = scalar_select %p349_p2, %s1510_s8, 1 }
  0x30   : > { %s355_s20 = scalar_select %p354_p5, %s1506_s30, 3 }
  0x31   : > { %s1126_s21 = sshll.u32 %s350_s18, 3  ;;  %372 = sbr.rel (%p1094_p6) target bundleno = 56 (0x38), region = 44  ;;  %vm373_vm0 = vcmask (!%p1094_p6), 261120   ;;  %v1524_v0 = vmov (!%p1094_p6), 0.0  }
  0x32   : > { %s353_s10 = scalar_lea.vmem %s1920_s0, %s1126_s21  ;;  %s1204_s9 = smul.u32 48, %s355_s20  ;;  %374 = vst.msk [vmem:[#allocation2] sm:$0xff] (!%p1094_p6), %vm373_vm0, %v1524_v0 }
  0x33   : > { %s1205_s29 = smul.u32 3, %s355_s20  ;;  %s1127_s14 = sshll.u32 %s355_s20, 6 }
  0x34   : > { %s358_s25 = scalar_lea.vmem %s1921_s1, %s1204_s9  ;;  %s1714_s22 = scalar_lea.vmem %s1923_s3, %s1127_s14 }
  0x35   : > { %s1719_s18 = scalar_lea.vmem %s1922_s2, %s1205_s29  ;;  %s1945_s21 = scalar_lea.vmem [#allocation7], %s1699_s17 }
  0x38 PF: > { %v1315_v1 = vld [vmem:[%s358_s25 + $0x4] ss:$12 sps:$4 sm:$0xff]   ;;  %v1317_v2 = vld [vmem:[%s358_s25] ss:$12 sps:$4 sm:$0xff]   ;;  %v1525_v3 = vmov 0   ;;  %v1526_v5 = vmov 0.0   ;;  %v387_v10 = vlaneseq }
  0x39   : > { %475 = vmatprep.mubr.bf16.mxu0 %v1525_v3  ;;  %443 = vmatprep.subr.bf16.mxu0 %v1315_v1  ;;  %v1318_v4 = vld [vmem:[%s358_s25 + $0x1c] ss:$12 sps:$4 sm:$0xff]   ;;  %v1320_v6 = vld [vmem:[%s358_s25 + $0x18] ss:$12 sps:$4 sm:$0xff]   ;;  %vm439_vm1 = vcmask 261120   ;;  %vm1527_vm2 = vmmov 0  }
  0x3a   : > { %1162 = vmatprep.subr.bf16.mxu1 %v1526_v5  ;;  %444 = vmatpush1.bf16.msra.mxu0 %v1317_v2  ;;  %v1321_v7 = vld [vmem:[%s353_s10] sm:$0xff]   ;;  %v1322_v8 = vld [vmem:[%s358_s25 + $0x8] ss:$12 sps:$4 sm:$0xff]   ;;  %v388_v11 = vshrl.u32 %v387_v10, 7  ;;  %vm644_vm3 = vcmask 1043456   ;;  %vm613_vm4 = vcmask 64512  }
  0x3b   : > { %445 = vmatprep.subr.bf16.mxu0 %v1318_v4  ;;  %v1323_v9 = vld [vmem:[%s358_s25 + $0x20] ss:$12 sps:$4 sm:$0xff]   ;;  %1164 = vmatprep.mubr.msk.bf16.mxu1 %vm1527_vm2, %v1526_v5  ;;  %v1326_v63 = vld [vmem:[%s1714_s22 + $0x10] sm:$0xff]   ;;  %v1327_v0 = vld [vmem:[%s1714_s22 + $0x18] sm:$0xff]   ;;  %vm637_vm5 = vcmask 60416   ;;  %p1114_p8 = scmp.ne.s32.totalorder %s1506_s30, 3 }
  0x3c   : > { %v393_v12 = vsub.s32 1, %v388_v11  ;;  %v385_v13 = vld [vmem:[%s1719_s18] sm:$0x7]  ;;  %v389_v16 = vsub.s32 0, %v388_v11  ;;  %v397_v29 = vsub.s32 2, %v388_v11  ;;  %v1325_v62 = vld [vmem:[%s1714_s22 + $0x8] sm:$0xff]  }
  0x3d   : > { %v1324_v61 = vld [vmem:[%s1714_s22] sm:$0xff]   ;;  %v1329_v2 = vld [vmem:[%s1714_s22 + $0x28] sm:$0xff]   ;;  %v1330_v3 = vld [vmem:[%s1714_s22 + $0x30] sm:$0xff]  }
  0x3e   : > { %446 = vmatpush1.bf16.msra.mxu0 %v1320_v6  ;;  %v394_v14 = vrot.slane %v385_v13, %v393_v12  ;;  %v390_v23 = vrot.slane %v385_v13, %v389_v16  ;;  %v398_v30 = vrot.slane %v385_v13, %v397_v29  ;;  %v1328_v1 = vld [vmem:[%s1714_s22 + $0x20] sm:$0xff]   ;;  %v1331_v13 = vld [vmem:[%s1714_s22 + $0x38] sm:$0xff]  }
  0x3f   : > { %1148 = vmatprep.subr.bf16.mxu0 %v1526_v5 }
  0x41   : > { %1102 = vmatmul.mubr.msk.bf16.vlgmr.msra.gmra.mrb[0].mxu0 %vm439_vm1, %v1321_v7 }
  0x42   : > { %1149 = vmatpush3.bf16.msra.mxu0 %v1322_v8  ;;  %1152 = vmatprep.mubr.msk.bf16.mxu0 %vm1527_vm2, %v1526_v5 }
  0x43   : > { %1150 = vmatprep.subr.bf16.mxu0 %v1526_v5 }
  0x46   : > { %1151 = vmatpush3.bf16.msra.mxu0 %v1323_v9 }
  0x47   : > { %1156 = vmatprep.subr.bf16.mxu0 %v1526_v5 }
  0x49   : > { %1153 = vmatmul.mubr.msk.bf16.vlgmr.msra.gmra.mrb[4].mxu0 %vm439_vm1, %v1321_v7 }
  0x4a   : > { %1158 = vmatprep.mubr.msk.bf16.mxu0 %vm1527_vm2, %v1526_v5 }
 0x114   : > { %v477_v15 = vpop.f32.mrb[0].mxu0 }
 0x115   : > { %v479_v17 = vpop.f32.mrb[1].mxu0  ;;  %v478_v26 = vadd.f32 %v477_v15, %v390_v23 }
 0x116   : > { %v480_v18 = vadd.f32 %v479_v17, %v394_v14  ;;  %v481_v19 = vpop.f32.mrb[2].mxu0 }
 0x117   : > { %v483_v20 = vpop.f32.mrb[3].mxu0  ;;  %v482_v25 = vadd.f32 %v481_v19, %v390_v23  ;;  %v527_v28 = vpack.c.bf16 %v478_v26, %v478_v26  ;;  %v734_v19 = vld [vmem:[#allocation2] sm:$0xff] }
 0x118   : > { %v529_v21 = vpack.c.bf16 %v480_v18, %v480_v18  ;;  %v484_v22 = vadd.f32 %v483_v20, %v394_v14 }
 0x119   : > { %v528_v27 = vpack.c.bf16 %v482_v25, %v482_v25  ;;  %v1115_v25 = vld [vmem:[%s1924_s4] ss:$0 sm:$0xff] (!%p1114_p8) }
 0x11a   : > { %v530_v24 = vpack.c.bf16 %v484_v22, %v484_v22  ;;  %1163 = vmatpush3.bf16.xpose.msra.mxu1 %v529_v21 }
 0x11b   : > { %1180 = vmatprep.subr.bf16.mxu1 %v1526_v5 }
 0x11c   : > { %1157 = vmatpush3.bf16.xpose.msra.mxu0 %v530_v24  ;;  %v520_v31 = vpop.f32.mrb[4].mxu0 }
 0x11d   : > { %1168 = vmatprep.subr.bf16.mxu0 %v1526_v5  ;;  %v521_v32 = vadd.f32 %v520_v31, %v398_v30  ;;  %v1154_v33 = vpop.f32.mrb[5].mxu0 }
 0x11e   : > { %v523_v34 = vpop.f32.mrb[6].mxu0 }
 0x11f   : > { %v531_v35 = vpack.c.bf16 %v521_v32, %v521_v32  ;;  %v524_v36 = vadd.f32 %v523_v34, %v398_v30  ;;  %v1155_v37 = vpop.f32.mrb[7].mxu0 }
 0x121   : > { %1165 = vmatmul.mubr.bf16.vlgmr.msra.gmra.mrb[0].mxu1 %v528_v27  ;;  %v646_v38 = vsel %vm644_vm3, %v531_v35, 0  ;;  %v532_v39 = vpack.c.bf16 %v524_v36, %v524_v36 }
 0x122   : > { %1196 = vmatprep.mubr.msk.bf16.mxu1 %vm1527_vm2, %v1526_v5  ;;  %1181 = vmatpush3.bf16.msra.mxu1 %v1324_v61 }
 0x123   : > { %1159 = vmatmul.mubr.bf16.vlgmr.msra.gmra.mrb[8].mxu0 %v527_v28  ;;  %v692_v40 = vsel %vm644_vm3, %v532_v39, 0  ;;  %1182 = vmatprep.subr.bf16.mxu1 %v1526_v5 }
 0x124   : > { %1170 = vmatprep.mubr.msk.bf16.mxu0 %vm1527_vm2, %v1526_v5  ;;  %1169 = vmatpush3.bf16.msra.mxu0 %v646_v38 }
 0x125   : > { %1174 = vmatprep.subr.bf16.mxu0 %v1526_v5 }
 0x126   : > { %1183 = vmatpush3.bf16.msra.mxu1 %v1325_v62 }
 0x127   : > { %1184 = vmatprep.subr.bf16.mxu1 %v1526_v5 }
 0x12a   : > { %1185 = vmatpush3.bf16.msra.mxu1 %v1326_v63 }
 0x12b   : > { %1186 = vmatprep.subr.bf16.mxu1 %v1526_v5 }
 0x12e   : > { %1187 = vmatpush3.bf16.msra.mxu1 %v1327_v0 }
 0x12f   : > { %1188 = vmatprep.subr.bf16.mxu1 %v1526_v5 }
 0x132   : > { %1189 = vmatpush3.bf16.msra.mxu1 %v1328_v1 }
 0x133   : > { %1190 = vmatprep.subr.bf16.mxu1 %v1526_v5 }
 0x136   : > { %1191 = vmatpush3.bf16.msra.mxu1 %v1329_v2 }
 0x137   : > { %1192 = vmatprep.subr.bf16.mxu1 %v1526_v5 }
 0x13a   : > { %1193 = vmatpush3.bf16.msra.mxu1 %v1330_v3 }
 0x13b   : > { %1194 = vmatprep.subr.bf16.mxu1 %v1526_v5 }
 0x13e   : > { %1195 = vmatpush3.bf16.msra.mxu1 %v1331_v13 }
 0x1f4   : > { %v607_v41 = vpop.f32.mrb[0].mxu1 }
 0x1f5   : > { %v1166_v42 = vpop.f32.mrb[1].mxu1  ;;  %v625_v43 = vsel %vm613_vm4, %v607_v41, -inf }
 0x1f6   : > { %626 = vmax.xlane.f32.xlu0 %v625_v43  ;;  %v567_v44 = vpop.f32.mrb[8].mxu0  ;;  %v610_v45 = vpop.f32.mrb[2].mxu1 }
 0x1f7   : > { %v1160_v46 = vpop.f32.mrb[9].mxu0  ;;  %v1167_v47 = vpop.f32.mrb[3].mxu1  ;;  %v614_v50 = vsel %vm613_vm4, %v567_v44, -inf }
 0x1f8   : > { %v570_v48 = vpop.f32.mrb[10].mxu0 }
 0x1f9   : > { %v1161_v49 = vpop.f32.mrb[11].mxu0 }
 0x1fa   : > { %615 = vmax.xlane.f32.xlu0 %v614_v50 }
 0x283   : > { %v627_v51 = vpop.xlane.xlu0 %626 }
 0x284   : > { %v628_v52 = vsub.f32 %v607_v41, %v627_v51 }
 0x286   : > { %v629_v53 = vmul.f32 1.442695, %v628_v52 }
 0x287   : > { %v616_v54 = vpop.xlane.xlu0 %615 }
 0x288   : > { %1332 = vpow2.f32 %v629_v53  ;;  %v617_v55 = vsub.f32 %v567_v44, %v616_v54 }
 0x28a   : > { %v618_v56 = vmul.f32 1.442695, %v617_v55 }
 0x28c   : > { %1334 = vpow2.f32 %v618_v56 }
 0x292   : > { %v1333_v57 = vpop.eup %1332 }
 0x293   : > { %v631_v58 = vsel %vm613_vm4, %v1333_v57, 0.0 }
 0x294   : > { %632 = vadd.xlane.f32.xlu1 %v631_v58 }
 0x296   : > { %v1335_v59 = vpop.eup %1334 }
 0x297   : > { %v620_v60 = vsel %vm613_vm4, %v1335_v59, 0.0 }
 0x298   : > { %621 = vadd.xlane.f32.xlu1 %v620_v60 }
 0x321   : > { %v633_v4 = vpop.xlane.xlu1 %632 }
 0x322   : > { %1336 = vrcp.f32 %v633_v4 }
 0x325   : > { %v622_v6 = vpop.xlane.xlu1 %621 }
 0x326   : > { %1338 = vrcp.f32 %v622_v6 }
 0x32c   : > { %v1337_v7 = vpop.eup %1336 }
 0x32d   : > { %v635_v8 = vmul.f32 %v1337_v7, %v1333_v57 }
 0x32f   : > { %v639_v9 = vpack.c.bf16 %v635_v8, %v635_v8 }
 0x330   : > { %v1339_v10 = vpop.eup %1338 }
 0x331   : > { %v624_v11 = vmul.f32 %v1339_v10, %v1335_v59  ;;  %640 = vst.msk [vmem:[%s341_s15] sm:$0xf] %vm637_vm5, %v639_v9  ;;  %1171 = vmatmul.mubr.msk.bf16.vlgmr.msra.gmra.mrb[12].mxu0 %vm613_vm4, %v639_v9 }
 0x332   : > { %1175 = vmatpush3.bf16.msra.mxu0 %v692_v40  ;;  %1176 = vmatprep.mubr.msk.bf16.mxu0 %vm1527_vm2, %v1526_v5 }
 0x333   : > { %v636_v12 = vpack.c.bf16 %v624_v11, %v624_v11 }
 0x335   : > { %638 = vst.msk [vmem:[%s334_s5] sm:$0xf] %vm637_vm5, %v636_v12 }
 0x33d   : > { %1177 = vmatmul.mubr.msk.bf16.vlgmr.msra.gmra.mrb[12].mxu0 %vm613_vm4, %v636_v12 }
 0x410   : > { %v728_v14 = vpop.f32.mrb[12].mxu0 }
 0x411   : > { %v735_v15 = vpack.c.bf16 %v728_v14, %v728_v14  ;;  %v1178_v16 = vpop.f32.mrb[13].mxu0 }
 0x412   : > { %v731_v17 = vpop.f32.mrb[14].mxu0 }
 0x413   : > { %v1179_v18 = vpop.f32.mrb[15].mxu0  ;;  %1197 = vmatmul.mubr.bf16.vlgmr.msra.gmra.mrb[4].mxu1 %v735_v15 }
 0x4e3   : > { %845 = sbr.rel (%p1114_p8) target bundleno = 1268 (0x4f4), region = 48 }
 0x4e6   : > { %v834_v20 = vpop.f32.mrb[4].mxu1 }
 0x4e7   : > { %v840_v21 = vadd.f32 %v834_v20, %v734_v19  ;;  %v1198_v22 = vpop.f32.mrb[5].mxu1 }
 0x4e8   : > { %v837_v23 = vpop.f32.mrb[6].mxu1 }
 0x4e9   : > { %841 = vst.msk [vmem:[#allocation2] sm:$0xff] %vm439_vm1, %v840_v21  ;;  %v1199_v5 = vpop.f32.mrb[7].mxu1 }
 0x4f0   : > { %v846_v24 = vld [vmem:[#allocation2] sm:$0xff] }
 0x4f1   : > { %v854_v26 = vadd.f32 %v1115_v25, %v846_v24 }
 0x4f3   : > { %855 = vst.msk [vmem:[%s1945_s21] sm:$0xff] %vm439_vm1, %v854_v26 }
 0x4f4 PF: > { %s1967_s26 = sadd.s32 4294967295, %s1522_s11   ;;  %s1119_s29 = sshll.u32 %s1510_s8, 2 }
 0x4f5   : > { %s1782_s27 = sand.u32 1, %s1967_s26   ;;  %s1786_s9 = sadd.s32 %s1506_s30, %s1119_s29 }
 0x4f6   : > { %s1120_s10 = sshll.u32 %s1786_s9, 6  ;;  %s897_s13 = sshll.u32 %s341_s15, 4  ;;  %s898_s13 = int_to_ptr.vmem [resolvable:$true] %s897_s13 }
 0x4f7   : > { %s1796_s24 = scalar_lea.hbm %s1926_s6, %s1120_s10  ;;  %s862_s20 = scalar_lea.sflag [#allocation6], %s1782_s27 }
 0x4f8   : > { %s1340_s23 = scalar_lea.vmem %s898_s13, 64  ;;  %s1528_s30 = smov [#allocation5]  }
 0x4f9   : > { %p1341_p9 = scmp.ne.s32.totalorder %s898_s13, %s1340_s23  ;;  %s1344_s12 = sshll.u32 %s1528_s30, 4  ;;  %s1345_s12 = int_to_ptr.vmem [resolvable:$false] %s1344_s12 }
 0x4fa   : > { %s1346_s18 = scalar_lea.vmem %s1345_s12, 128  ;;  %p1347_p0 = scmp.lt.s32.totalorder %s898_s13, %s1345_s12 }
 0x4fb   : > { %p1342_p10 = pnand %p1341_p9, %p1646_p3  ;;  %p1348_p1 = scmp.lt.s32.totalorder %s1346_s18, %s1340_s23 }
 0x4fd   : > { %p1343_p11 = pneg %p1342_p10  ;;  %p1349_p4 = por %p1348_p1, %p1347_p0 }
 0x4ff   : > { %p1350_p2 = pnand %p1349_p4, %p1343_p11 }
 0x501   : > { %1353 = shalt.err (!%p1350_p2)
}
 0x502   : > { %s1354_s15 = scalar_lea.hbm %s1796_s24, 64  ;;  %s1358_s26 = scalar_lea.hbm %s1926_s6, 512 }
 0x503   : > { %p1355_p5 = scmp.ne.s32.totalorder %s1796_s24, %s1354_s15  ;;  %p1359_p9 = scmp.lt.u32.totalorder %s1796_s24, %s1926_s6 }
 0x504   : > { %p1360_p10 = scmp.lt.u32.totalorder %s1358_s26, %s1354_s15  ;;  %p1362_p0 = scmp.lt.u32.totalorder %s1354_s15, %s1796_s24 }
 0x505   : > { %p1356_p6 = pnand %p1355_p5, %p1646_p3 }
 0x506   : > { %p1361_p11 = por %p1360_p10, %p1359_p9 }
 0x507   : > { %p1357_p8 = pneg %p1356_p6 }
 0x508   : > { %p1363_p1 = por %p1362_p0, %p1361_p11 }
 0x50a   : > { %p1364_p4 = pnand %p1363_p1, %p1357_p8 }
 0x50c   : > { %1367 = shalt.err (!%p1364_p4)
}
 0x50d   : > { %1207 = dma.vmem_to_hbm [thread:$0]  (%p1646_p3), %s898_s13, 64, %s1796_s24, %s862_s20  }
 0x50e   : > { %s1968_s30 = sld [smem:[#allocation24_spill]]  ;;  %s882_s15 = sshll.u32 %s334_s5, 4  ;;  %s1828_s15 = int_to_ptr.vmem [resolvable:$true] %s882_s15 }
 0x50f   : > { %s1123_s7 = sshll.u32 %s1510_s8, 7  ;;  %s1970_s29 = sld [smem:[#allocation25_spill]] }
 0x510   : > { %s1972_s13 = sand.u32 1, %s1498_s28   ;;  %s1368_s24 = scalar_lea.vmem %s1828_s15, 64 }
 0x511   : > { %s857_s9 = scalar_lea.sflag [#allocation4], %s1972_s13  ;;  %p1369_p2 = scmp.ne.s32.totalorder %s1828_s15, %s1368_s24 }
 0x512   : > { %s1529_s16 = smov [#allocation3]  }
 0x513   : > { %p1370_p5 = pnand %p1369_p2, %p1646_p3  ;;  %s1372_s5 = sshll.u32 %s1529_s16, 4  ;;  %s1373_s5 = int_to_ptr.vmem [resolvable:$false] %s1372_s5 }
 0x514   : > { %s1969_s12 = smov %s1968_s30  ;;  %s1823_s18 = scalar_lea.hbm %s1968_s30, %s1120_s10 }
 0x515   : > { %s1971_s14 = smov %s1970_s29  ;;  %s1833_s21 = scalar_lea.hbm %s1970_s29, %s1123_s7 }
 0x516   : > { %p1371_p6 = pneg %p1370_p5  ;;  %s1374_s8 = scalar_lea.vmem %s1373_s5, 128 }
 0x517   : > { %p1375_p8 = scmp.lt.s32.totalorder %s1828_s15, %s1373_s5  ;;  %p1376_p9 = scmp.lt.s32.totalorder %s1374_s8, %s1368_s24 }
 0x519   : > { %p1377_p10 = por %p1376_p9, %p1375_p8 }
 0x51b   : > { %p1378_p11 = pnand %p1377_p10, %p1371_p6 }
 0x51d   : > { %1381 = shalt.err (!%p1378_p11)
}
 0x51e   : > { %s1382_s10 = scalar_lea.hbm %s1823_s18, 64  ;;  %s1386_s30 = scalar_lea.hbm %s1969_s12, 512 }
 0x51f   : > { %p1383_p0 = scmp.ne.s32.totalorder %s1823_s18, %s1382_s10  ;;  %p1387_p2 = scmp.lt.u32.totalorder %s1823_s18, %s1969_s12 }
 0x520   : > { %p1388_p5 = scmp.lt.u32.totalorder %s1386_s30, %s1382_s10  ;;  %p1390_p8 = scmp.lt.u32.totalorder %s1382_s10, %s1823_s18 }
 0x521   : > { %p1384_p1 = pnand %p1383_p0, %p1646_p3 }
 0x522   : > { %p1389_p6 = por %p1388_p5, %p1387_p2 }
 0x523   : > { %p1385_p4 = pneg %p1384_p1 }
 0x524   : > { %p1391_p9 = por %p1390_p8, %p1389_p6 }
 0x526   : > { %p1392_p10 = pnand %p1391_p9, %p1385_p4 }
 0x528   : > { %1395 = shalt.err (!%p1392_p10)
}
 0x529   : > { %1206 = dma.vmem_to_hbm [thread:$0]  (%p1646_p3), %s1828_s15, 64, %s1823_s18, %s857_s9  }
 0x52a   : > { %s1974_s29 = scalar_lea.vmem [#allocation7], %s1699_s17  ;;  %s1530_s16 = smov [#allocation7]  }
 0x52b   : > { %s910_s13 = sshll.u32 %s1974_s29, 4  ;;  %s1400_s5 = sshll.u32 %s1530_s16, 4  ;;  %s911_s13 = int_to_ptr.vmem [resolvable:$true] %s910_s13  ;;  %s1401_s5 = int_to_ptr.vmem [resolvable:$false] %s1400_s5 }
 0x52c   : > { %s1396_s24 = scalar_lea.vmem %s911_s13, 128  ;;  %s1402_s8 = scalar_lea.vmem %s1401_s5, 256 }
 0x52d   : > { %p1397_p11 = scmp.ne.s32.totalorder %s911_s13, %s1396_s24  ;;  %p1403_p4 = scmp.lt.s32.totalorder %s911_s13, %s1401_s5 }
 0x52e   : > { %p1404_p2 = scmp.lt.s32.totalorder %s1402_s8, %s1396_s24 }
 0x52f   : > { %p1398_p0 = pnand %p1397_p11, %p1675_p12 }
 0x530   : > { %p1405_p5 = por %p1404_p2, %p1403_p4 }
 0x531   : > { %p1399_p1 = pneg %p1398_p0 }
 0x533   : > { %p1406_p6 = pnand %p1405_p5, %p1399_p1 }
 0x535   : > { %1409 = shalt.err (!%p1406_p6)
}
 0x536   : > { %s1410_s19 = scalar_lea.hbm %s1833_s21, 128  ;;  %s1414_s15 = scalar_lea.hbm %s1971_s14, 256 }
 0x537   : > { %p1411_p3 = scmp.ne.s32.totalorder %s1833_s21, %s1410_s19  ;;  %p1415_p10 = scmp.lt.u32.totalorder %s1833_s21, %s1971_s14 }
 0x538   : > { %p1416_p11 = scmp.lt.u32.totalorder %s1414_s15, %s1410_s19  ;;  %p1418_p1 = scmp.lt.u32.totalorder %s1410_s19, %s1833_s21 }
 0x539   : > { %p1412_p8 = pnand %p1411_p3, %p1675_p12 }
 0x53a   : > { %p1417_p0 = por %p1416_p11, %p1415_p10 }
 0x53b   : > { %p1413_p9 = pneg %p1412_p8 }
 0x53c   : > { %p1419_p4 = por %p1418_p1, %p1417_p0 }
 0x53e   : > { %p1420_p2 = pnand %p1419_p4, %p1413_p9 }
 0x540   : > { %1423 = shalt.err (!%p1420_p2)
}
 0x541   : > { %1208 = dma.vmem_to_hbm [thread:$0]  (%p1675_p12), %s911_s13, 128, %s1833_s21, %s862_s20  }
 0x542 PF: > { %s1975_s22 = sld [smem:[#allocation13_spill]]  ;;  %p1222_p5 = scmp.ge.s32.totalorder %s1522_s11, 2 }
 0x544   : > { %p1213_p6 = pnand %p1222_p5, %p1663_p7 }
 0x548   : > { %s922_s30 = sand.u32 1, %s1975_s22  }
 0x549   : > { %s923_s7 = scalar_lea.sflag [#allocation4], %s922_s30 }
 0x54a   : > { %1469 = dma.done.wait (!%p1213_p6), %s923_s7, 64  }
 0x54b   : > { %1471 = vsyncadd (!%p1213_p6), %s923_s7, 4294967232  ;;  %s1977_s25 = sadd.s32 4294967294, %s1522_s11  }
 0x54c   : > { %s931_s29 = sand.u32 1, %s1977_s25  }
 0x54d   : > { %s932_s24 = scalar_lea.sflag [#allocation6], %s931_s29 }
 0x54e   : > { %1473 = dma.done.wait (!%p1213_p6), %s932_s24, 64  }
 0x54f   : > { %1475 = vsyncadd (!%p1213_p6), %s932_s24, 4294967232  ;;  %p1219_p12 = pnand %p1222_p5, %p1687_p13 }
 0x551   : > { %1477 = dma.done.wait (!%p1219_p12), %s932_s24, 128  }
 0x552   : > { %1479 = vsyncadd (!%p1219_p12), %s932_s24, 4294967168  ;;  %s24_s11 = sadd.s32 1, %s1522_s11   ;;  %s1979_s24 = sld [smem:[#allocation11_spill]] }
 0x553   : > { %p21_p3 = scmp.ge.s32.totalorder %s24_s11, 10   ;;  %s1980_s25 = sld [smem:[#allocation12_spill]] }
 0x554   : > { %s1981_s26 = sld [smem:[#allocation21_spill]]  ;;  %s1982_s21 = sld [smem:[#allocation14_spill]] }
 0x555   : > { %s1983_s29 = sld [smem:[#allocation22_spill]]  ;;  %s1984_s30 = sld [smem:[#allocation15_spill]] }
 0x556   : > { %s1985_s8 = sld [smem:[#allocation16_spill]]  ;;  %s1986_s9 = sld [smem:[#allocation17_spill]] }
 0x557   : > { %s1987_s10 = sld [smem:[#allocation18_spill]]  ;;  %s1988_s27 = smov %s1498_s28 }
 0x558   :  { %23 = sbr.rel (!%p21_p3) target bundleno = 12 (0xc), region = 124 }
 0x55a   : > { %s1989_s28 = smov %s1982_s21 }
 0x55f   :  { %946 = vsyncpa [#allocation4], 1 }
 0x560   :  { %948 = vsyncpa [#allocation4 + $0x1], 1 }
 0x561   :  { %949 = vsyncpa [#allocation6], 1 }
 0x562   :  { %951 = vsyncpa [#allocation6 + $0x1], 1 }

</bundles_post_ra>
